<compile_context>
chip_gen: v7x
topology: tpu7x:2x2x1
jax: 0.10.0
libtpu: 0.0.40
codegen_flags: <defaults>
</compile_context>

<pallas_src>
import functools

import jax
import jax.numpy as jnp
from jax.experimental import pallas as pl
from jax.experimental.pallas import tpu as pltpu


def _round_up(n: int, m: int) -> int:
    return ((n + m - 1) // m) * m


def q_net_kernel(x_ref, w1_ref, b1_ref, w2_ref, b2_ref, o_ref):
    # Two MXU matmuls + VPU bias/ReLU, everything resident in VMEM.
    x = x_ref[...]                                              # (TB, n_states_p)
    h = jnp.dot(x, w1_ref[...], preferred_element_type=jnp.float32)
    h = jnp.maximum(h + b1_ref[...], 0.0)                       # ReLU(inplace=True) semantics
    y = jnp.dot(h, w2_ref[...], preferred_element_type=jnp.float32)
    o_ref[...] = (y + b2_ref[...]).astype(o_ref.dtype)          # (TB, n_actions_p)


def pad_qnet_params(w1, b1, w2, b2):
    """Zero-pad parameters once (at init, not per call) to HW-friendly shapes.

    w1: (n_states, hidden), b1: (hidden,), w2: (hidden, n_actions), b2: (n_actions,).
    Weights are stored as (in, out) so the kernel has no transposes.
      n_states  -> round_up(., 8)    (sublane-aligned K for the first matmul)
      hidden    -> round_up(., 128)  (lane-dense hidden)
      n_actions -> round_up(., 8)    (narrow output: 16x less write traffic than 128)
    """
    n_states, hidden = w1.shape
    _, n_actions = w2.shape
    n_states_p = _round_up(n_states, 8)
    hidden_p = _round_up(hidden, 128)
    n_actions_p = _round_up(n_actions, 8)

    w1p = jnp.zeros((n_states_p, hidden_p), jnp.float32).at[:n_states, :hidden].set(w1)
    b1p = jnp.zeros((1, hidden_p), jnp.float32).at[0, :hidden].set(b1)
    w2p = jnp.zeros((hidden_p, n_actions_p), jnp.float32).at[:hidden, :n_actions].set(w2)
    b2p = jnp.zeros((1, n_actions_p), jnp.float32).at[0, :n_actions].set(b2)
    return (w1p, b1p, w2p, b2p), (n_states, n_actions)


@functools.partial(jax.jit, static_argnames=("n_actions", "tb"))
def q_net_forward(x, w1p, b1p, w2p, b2p, *, n_actions, tb=2048):
    """x: (B, n_states) f32 (unpadded). Padded params from pad_qnet_params.
    Returns (B, n_actions) f32 = relu(x @ W1 + b1) @ W2 + b2."""
    B, n_states = x.shape
    n_states_p = w1p.shape[0]
    hidden_p = w1p.shape[1]
    n_actions_p = w2p.shape[1]

    # Batch tiling: minimal padding for non-divisible B; even step count for
    # v7x's two TensorCores when more than one step is needed.
    n_tiles = pl.cdiv(B, tb)
    if n_tiles > 1:
        n_tiles = _round_up(n_tiles, 2)
    TB = _round_up(pl.cdiv(B, n_tiles), 8)
    B_pad = TB * n_tiles

    # Single pad op: rows to B_pad, cols to n_states_p. Padded cols hit zero
    # weight rows; padded rows produce garbage that is sliced off below.
    x_p = jnp.pad(x.astype(jnp.float32),
                  ((0, B_pad - B), (0, n_states_p - n_states)))

    out = pl.pallas_call(
        q_net_kernel,
        out_shape=jax.ShapeDtypeStruct((B_pad, n_actions_p), jnp.float32),
        grid=(n_tiles,),
        in_specs=[
            # batch-tiled input (double-buffered across the grid)
            pl.BlockSpec((TB, n_states_p), lambda i: (i, 0)),
            # weights / biases: grid-invariant, stay resident in VMEM
            pl.BlockSpec((n_states_p, hidden_p), lambda i: (0, 0)),
            pl.BlockSpec((1, hidden_p), lambda i: (0, 0)),
            pl.BlockSpec((hidden_p, n_actions_p), lambda i: (0, 0)),
            pl.BlockSpec((1, n_actions_p), lambda i: (0, 0)),
        ],
        # narrow (TB, 8) output block: last dim equals the full array dim (legal),
        # 16x less HBM write traffic than a 128-wide padded output.
        out_specs=pl.BlockSpec((TB, n_actions_p), lambda i: (i, 0)),
        compiler_params=pltpu.CompilerParams(
            dimension_semantics=("parallel",)),
    )(x_p, w1p, b1p, w2p, b2p)

    # Slice back to the logical shape outside the kernel. NOTE: padded rows of
    # `out` are NOT zero (relu(b1) @ W2 + b2); never consume `out` pre-slice.
    return out[:B, :n_actions]


if __name__ == "__main__":
    # CartPole-like dims: n_states=4, n_actions=2, hidden=50
    n_states, hidden, n_actions = 4, 50, 2

    key = jax.random.PRNGKey(0)
    kx, kw1, kb1, kw2, kb2, kx2 = jax.random.split(key, 6)

    # nn.init.normal_(weight, std=0.1); biases keep PyTorch default
    # U(-1/sqrt(fan_in), 1/sqrt(fan_in)).
    w1 = 0.1 * jax.random.normal(kw1, (n_states, hidden), jnp.float32)
    b1 = jax.random.uniform(kb1, (hidden,), jnp.float32,
                            minval=-1.0 / jnp.sqrt(n_states),
                            maxval=1.0 / jnp.sqrt(n_states))
    w2 = 0.1 * jax.random.normal(kw2, (hidden, n_actions), jnp.float32)
    b2 = jax.random.uniform(kb2, (n_actions,), jnp.float32,
                            minval=-1.0 / jnp.sqrt(hidden),
                            maxval=1.0 / jnp.sqrt(hidden))

    (w1p, b1p, w2p, b2p), (_, na) = pad_qnet_params(w1, b1, w2, b2)

    def ref_fn(xx):
        return jnp.maximum(xx @ w1 + b1, 0.0) @ w2 + b2

    # Small case (single env-step style batch).
    B = 2
    x = jax.random.normal(kx, (B, n_states), jnp.float32)
    out = jax.block_until_ready(q_net_forward(x, w1p, b1p, w2p, b2p, n_actions=na))
    assert out.shape == (B, n_actions)
    assert jnp.allclose(out, ref_fn(x), atol=1e-5, rtol=1e-5)

    # Larger, non-multiple-of-tile batch (replay-buffer style): exercises the
    # minimal-padding TB selection and the multi-tile grid path.
    B2 = 1037
    x2 = jax.random.normal(kx2, (B2, n_states), jnp.float32)
    out2 = jax.block_until_ready(
        q_net_forward(x2, w1p, b1p, w2p, b2p, n_actions=na, tb=512))
    assert out2.shape == (B2, n_actions)
    assert jnp.allclose(out2, ref_fn(x2), atol=1e-5, rtol=1e-5)

    print("KERNEL_OK")
</pallas_src>

<mosaic_0001>
module attributes {stable_mosaic.version = 11 : i64} {
  func.func @q_net_kernel(%arg0: i32, %arg1: memref<8x8xf32, #tpu.memory_space<vmem>>, %arg2: memref<8x128xf32, #tpu.memory_space<vmem>>, %arg3: memref<1x128xf32, #tpu.memory_space<vmem>>, %arg4: memref<128x8xf32, #tpu.memory_space<vmem>>, %arg5: memref<1x8xf32, #tpu.memory_space<vmem>>, %arg6: memref<8x8xf32, #tpu.memory_space<vmem>>) attributes {dimension_semantics = [#tpu.dimension_semantics<parallel>], iteration_bounds = array<i64: 1>, scalar_prefetch = 0 : i64, scratch_operands = 0 : i64, tpu.core_type = #tpu.core_type<tc>, window_params = [{transform_indices = @transform_0, window_bounds = array<i64: 8, 8>}, {pipeline_mode = #tpu.pipeline_mode<synchronous>, transform_indices = @transform_1, window_bounds = array<i64: 8, 128>}, {pipeline_mode = #tpu.pipeline_mode<synchronous>, transform_indices = @transform_2, window_bounds = array<i64: 1, 128>}, {pipeline_mode = #tpu.pipeline_mode<synchronous>, transform_indices = @transform_3, window_bounds = array<i64: 128, 8>}, {pipeline_mode = #tpu.pipeline_mode<synchronous>, transform_indices = @transform_4, window_bounds = array<i64: 1, 8>}, {transform_indices = @transform_5, window_bounds = array<i64: 8, 8>}]} {
    %c0 = arith.constant 0 : index
    %c0_0 = arith.constant 0 : index
    %0 = vector.load %arg1[%c0, %c0_0] : memref<8x8xf32, #tpu.memory_space<vmem>>, vector<8x8xf32>
    %c0_1 = arith.constant 0 : index
    %c0_2 = arith.constant 0 : index
    %1 = vector.load %arg2[%c0_1, %c0_2] : memref<8x128xf32, #tpu.memory_space<vmem>>, vector<8x128xf32>
    %cst = arith.constant dense<0.000000e+00> : vector<8x128xf32>
    %2 = tpu.matmul %0, %1, %cst {dimension_numbers = #tpu.dot_dimension_numbers<[1], [0], [0], [1], [0, 0, 1, 1], [], []>} : vector<8x8xf32>, vector<8x128xf32>, vector<8x128xf32> -> vector<8x128xf32>
    %c0_3 = arith.constant 0 : index
    %c0_4 = arith.constant 0 : index
    %3 = vector.load %arg3[%c0_3, %c0_4] : memref<1x128xf32, #tpu.memory_space<vmem>>, vector<1x128xf32>
    %4 = vector.broadcast %3 : vector<1x128xf32> to vector<8x128xf32>
    %5 = arith.addf %2, %4 : vector<8x128xf32>
    %cst_5 = arith.constant 0.000000e+00 : f32
    %6 = vector.broadcast %cst_5 : f32 to vector<8x128xf32>
    %7 = arith.maximumf %5, %6 : vector<8x128xf32>
    %c0_6 = arith.constant 0 : index
    %c0_7 = arith.constant 0 : index
    %8 = vector.load %arg4[%c0_6, %c0_7] : memref<128x8xf32, #tpu.memory_space<vmem>>, vector<128x8xf32>
    %cst_8 = arith.constant dense<0.000000e+00> : vector<8x8xf32>
    %9 = tpu.matmul %7, %8, %cst_8 {dimension_numbers = #tpu.dot_dimension_numbers<[1], [0], [0], [1], [0, 0, 1, 1], [], []>} : vector<8x128xf32>, vector<128x8xf32>, vector<8x8xf32> -> vector<8x8xf32>
    %c0_9 = arith.constant 0 : index
    %c0_10 = arith.constant 0 : index
    %10 = vector.load %arg5[%c0_9, %c0_10] : memref<1x8xf32, #tpu.memory_space<vmem>>, vector<1x8xf32>
    %11 = vector.broadcast %10 : vector<1x8xf32> to vector<8x8xf32>
    %12 = arith.addf %9, %11 : vector<8x8xf32>
    %c0_11 = arith.constant 0 : index
    %c0_12 = arith.constant 0 : index
    %13 = vector.load %arg6[%c0_11, %c0_12] : memref<8x8xf32, #tpu.memory_space<vmem>>, vector<8x8xf32>
    tpu.vector_store %arg6[%c0_11, %c0_12], %12 {strides = array<i32>} : memref<8x8xf32, #tpu.memory_space<vmem>>, vector<8x8xf32>,
    return
  }
  func.func @transform_0(%arg0: i32) -> (i32, i32) {
    %c0_i32 = arith.constant 0 : i32
    %c0_i32_0 = arith.constant 0 : i32
    return %arg0, %c0_i32 : i32, i32
  }
  func.func @transform_1(%arg0: i32) -> (i32, i32) {
    %c0_i32 = arith.constant 0 : i32
    %c0_i32_0 = arith.constant 0 : i32
    %c0_i32_1 = arith.constant 0 : i32
    return %c0_i32, %c0_i32_0 : i32, i32
  }
  func.func @transform_2(%arg0: i32) -> (i32, i32) {
    %c0_i32 = arith.constant 0 : i32
    %c0_i32_0 = arith.constant 0 : i32
    %c0_i32_1 = arith.constant 0 : i32
    return %c0_i32, %c0_i32_0 : i32, i32
  }
  func.func @transform_3(%arg0: i32) -> (i32, i32) {
    %c0_i32 = arith.constant 0 : i32
    %c0_i32_0 = arith.constant 0 : i32
    %c0_i32_1 = arith.constant 0 : i32
    return %c0_i32, %c0_i32_0 : i32, i32
  }
  func.func @transform_4(%arg0: i32) -> (i32, i32) {
    %c0_i32 = arith.constant 0 : i32
    %c0_i32_0 = arith.constant 0 : i32
    %c0_i32_1 = arith.constant 0 : i32
    return %c0_i32, %c0_i32_0 : i32, i32
  }
  func.func @transform_5(%arg0: i32) -> (i32, i32) {
    %c0_i32 = arith.constant 0 : i32
    %c0_i32_0 = arith.constant 0 : i32
    return %arg0, %c0_i32 : i32, i32
  }
}

</mosaic_0001>

<bundles_post_ra>
// kernel: q_net_forward.1
= control target key start
LH: loop header
LB: loop body
LE: loop exit
PB: predicated region body
PF: predicated region fallthrough
CT: control target
= control target key end

     0   :  { %vm29_vm0 = vcmask 64512   ;;  %v291_v0 = vmov 0.0   ;;  %vm292_vm1 = vmmov 0   ;;  %v293_v4 = vmov 0.0|0.0   ;;  %s389_s1 = inlined_call_operand.vmem [shape: f32[8,128], index: 1, kind: input, shape index: {}]   ;;  %s390_s0 = inlined_call_operand.vmem [shape: f32[8,8], index: 0, kind: input, shape index: {}]   ;;  %s391_s3 = inlined_call_operand.vmem [shape: f32[128,8], index: 3, kind: input, shape index: {}]   ;;  %s392_s2 = inlined_call_operand.vmem [shape: f32[1,128], index: 2, kind: input, shape index: {}]   ;;  %s393_s4 = inlined_call_operand.vmem [shape: f32[1,8], index: 4, kind: input, shape index: {}]   ;;  %s394_s5 = inlined_call_operand.vmem [shape: f32[8,8], index: 5, kind: output, shape index: {}]  }
   0x1   :  { %224 = vmatprep.subr.mxu0 %v291_v0  ;;  %v21_v1 = vld [vmem:[%s389_s1] sm:$0xff]  ;;  %226 = vmatprep.mubr.msk.f32.mxu0 %vm292_vm1, %v291_v0  ;;  %v105_v5 = vld [vmem:[%s391_s3 + $0x8] sm:$0xff]  ;;  %v106_v6 = vld [vmem:[%s391_s3 + $0x10] sm:$0xff] }
   0x2   :  { %v20_v2 = vld [vmem:[%s390_s0] sm:$0xff]  ;;  %225 = vmatpush3.msra.mxu0 %v21_v1  ;;  %264 = vmatprep.subr.bf16.mxu1 %v293_v4  ;;  %v107_v7 = vld [vmem:[%s391_s3 + $0x18] sm:$0xff]  ;;  %v109_v11 = vld [vmem:[%s391_s3 + $0x28] sm:$0xff] }
   0x3   :  { %v104_v3 = vld [vmem:[%s391_s3] sm:$0xff]  ;;  %227 = vmatmul.mubr.msk.f32.vlgmr.msra.gmra.mrb[0].mxu0 %vm29_vm0, %v20_v2  ;;  %261 = vmatprep.mubr.msk.f32.mxu1 %vm292_vm1, %v291_v0  ;;  %v268_v9 = vpack.c.bf16 %v107_v7, %v106_v6  ;;  %v110_v13 = vld [vmem:[%s391_s3 + $0x30] sm:$0xff]  ;;  %v111_v14 = vld [vmem:[%s391_s3 + $0x38] sm:$0xff] }
   0x4   :  { %v265_v8 = vpack.c.bf16 %v105_v5, %v104_v3  ;;  %v108_v10 = vld [vmem:[%s391_s3 + $0x20] sm:$0xff]  ;;  %v274_v15 = vpack.c.bf16 %v111_v14, %v110_v13  ;;  %v113_v17 = vld [vmem:[%s391_s3 + $0x48] sm:$0xff]  ;;  %v114_v19 = vld [vmem:[%s391_s3 + $0x50] sm:$0xff] }
   0x5   :  { %v271_v12 = vpack.c.bf16 %v109_v11, %v108_v10  ;;  %v112_v16 = vld [vmem:[%s391_s3 + $0x40] sm:$0xff]  ;;  %v115_v20 = vld [vmem:[%s391_s3 + $0x58] sm:$0xff]  ;;  %v117_v23 = vld [vmem:[%s391_s3 + $0x68] sm:$0xff] }
   0x6   :  { %266 = vmatpush3.bf16.msra.mxu1 %v265_v8  ;;  %v277_v18 = vpack.c.bf16 %v113_v17, %v112_v16  ;;  %v280_v21 = vpack.c.bf16 %v115_v20, %v114_v19  ;;  %v116_v22 = vld [vmem:[%s391_s3 + $0x60] sm:$0xff]  ;;  %v118_v25 = vld [vmem:[%s391_s3 + $0x70] sm:$0xff]  ;;  %v119_v26 = vld [vmem:[%s391_s3 + $0x78] sm:$0xff] }
   0x7   :  { %267 = vmatprep.subr.bf16.mxu1 %v293_v4  ;;  %v283_v24 = vpack.c.bf16 %v117_v23, %v116_v22  ;;  %v286_v27 = vpack.c.bf16 %v119_v26, %v118_v25  ;;  %v202_v28 = vld [vmem:[%s392_s2] ss:$0 sm:$0xff] }
   0x8   :  { %v204_v33 = vld [vmem:[%s393_s4] ss:$0 sm:$0xff] }
   0xa   :  { %269 = vmatpush3.bf16.msra.mxu1 %v268_v9 }
   0xb   :  { %270 = vmatprep.subr.bf16.mxu1 %v293_v4 }
   0xe   :  { %272 = vmatpush3.bf16.msra.mxu1 %v271_v12 }
   0xf   :  { %273 = vmatprep.subr.bf16.mxu1 %v293_v4 }
  0x12   :  { %275 = vmatpush3.bf16.msra.mxu1 %v274_v15 }
  0x13   :  { %276 = vmatprep.subr.bf16.mxu1 %v293_v4 }
  0x16   :  { %278 = vmatpush3.bf16.msra.mxu1 %v277_v18 }
  0x17   :  { %279 = vmatprep.subr.bf16.mxu1 %v293_v4 }
  0x1a   :  { %281 = vmatpush3.bf16.msra.mxu1 %v280_v21 }
  0x1b   :  { %282 = vmatprep.subr.bf16.mxu1 %v293_v4 }
  0x1e   :  { %284 = vmatpush3.bf16.msra.mxu1 %v283_v24 }
  0x1f   :  { %285 = vmatprep.subr.bf16.mxu1 %v293_v4 }
  0x22   :  { %287 = vmatpush3.bf16.msra.mxu1 %v286_v27 }
  0xd6   :  { %v99_v29 = vpop.f32.mrb[0].mxu0 }
  0xd7   :  { %v100_v30 = vadd.f32 %v202_v28, %v99_v29  ;;  %v228_v31 = vpop.f32.mrb[1].mxu0 }
  0xd9   :  { %v103_v32 = vmax.f32 %v100_v30, 0.0 }
  0xdb   :  { %262 = vmatmul.mubr.f32.vlgmr.msra.gmra.mrb[0].mxu1 %v103_v32 }
 0x1ae   :  { %v193_v34 = vpop.f32.mrb[0].mxu1 }
 0x1af   :  { %v194_v35 = vadd.f32 %v204_v33, %v193_v34  ;;  %v263_v36 = vpop.f32.mrb[1].mxu1 }
 0x1b1   :  { %197 = vst.msk [vmem:[%s394_s5] sm:$0xff] %vm29_vm0, %v194_v35 }

</bundles_post_ra>
